<compile_context>
chip_gen: v7x
topology: tpu7x:2x2x1
jax: 0.10.0
libtpu: 0.0.40
codegen_flags: <defaults>
</compile_context>

<pallas_src>
import functools

import jax
import jax.numpy as jnp
import numpy as np
from jax import lax
from jax.experimental import pallas as pl
from jax.experimental.pallas import tpu as pltpu


def _round_up(a, b):
    return (a + b - 1) // b * b


# ---------------------------------------------------------------------------
# Pallas kernels
# ---------------------------------------------------------------------------
def _gemm_lrelu_stats_kernel(w_ref, p_ref, y_ref, sum_ref, sq_ref, acc_ref, *,
                             neg_slope):
    """Fused (c2,K)x(K,tile_m) GEMM + LeakyReLU + per-tile BN partial stats.

    w_ref:   (c2, tile_k)   bf16
    p_ref:   (tile_k, tile_m) bf16   (transposed im2col patches)
    y_ref:   (c2, tile_m)   f32  lane-dense activation output
    sum_ref: (1, c2, 1)     f32  per-tile per-channel sum
    sq_ref:  (1, c2, 1)     f32  per-tile per-channel sum of squares
    acc_ref: (c2, tile_m)   f32  VMEM accumulator across the K grid axis
    """
    kt = pl.program_id(1)

    @pl.when(kt == 0)
    def _():
        acc_ref[...] = jnp.zeros_like(acc_ref)

    acc_ref[...] += jnp.dot(w_ref[...], p_ref[...],
                            preferred_element_type=jnp.float32)

    @pl.when(kt == pl.num_programs(1) - 1)
    def _():
        acc = acc_ref[...]
        y = jnp.where(acc >= 0, acc, neg_slope * acc)   # LeakyReLU (f32)
        y_ref[...] = y
        # Lane-axis reductions; zero-padded M columns contribute exactly 0.
        sum_ref[...] = jnp.sum(y, axis=-1, keepdims=True)[None]
        sq_ref[...] = jnp.sum(y * y, axis=-1, keepdims=True)[None]


def _bn_apply_kernel(ab_ref, y_ref, o_ref):
    """Per-channel affine normalize: o = y*scale + shift (all f32, lane-dense).

    ab_ref: (c2, 2) [scale, shift],  y_ref/o_ref: (c2, tile_m)
    """
    scale = ab_ref[:, 0:1]   # (c2, 1) broadcast along lanes
    shift = ab_ref[:, 1:2]
    o_ref[...] = y_ref[...] * scale + shift


# ---------------------------------------------------------------------------
# Host-side wrapper
# ---------------------------------------------------------------------------
def _im2col_t(x, k, p, s, d):
    """x: (N, C, H, W) -> transposed patches (C*k*k, N*Ho*Wo), plus (Ho, Wo)."""
    n, c, h, w = x.shape
    ho = (h + 2 * p - d * (k - 1) - 1) // s + 1
    wo = (w + 2 * p - d * (k - 1) - 1) // s + 1
    xp = jnp.pad(x, ((0, 0), (0, 0), (p, p), (p, p)))
    cols = []
    for i in range(k):
        for j in range(k):
            sl = xp[:, :, i * d: i * d + s * ho: s, j * d: j * d + s * wo: s]
            cols.append(sl)                          # (N, C, Ho, Wo)
    pats = jnp.stack(cols, axis=0).reshape(k, k, n, c, ho, wo)
    # K axis ordered (c, kh, kw) to match weight.reshape(c2, c1*k*k); M=(n,ho,wo)
    pats = pats.transpose(3, 0, 1, 2, 4, 5).reshape(c * k * k, n * ho * wo)
    return pats, ho, wo


def conv_module_forward(x, weight, gamma, beta, *, k, p, s, d, c2,
                        eps=1e-5, tile_m=1024, max_tile_k=512):
    """Pallas implementation of Conv(c1, c2, k, p, s, d).forward(x).

    x:      (N, c1, H, W)  float32, NCHW
    weight: (c2, c1, k, k) float32 (PyTorch OIHW)
    gamma, beta: (c2,) float32
    returns (N, c2, Ho, Wo) float32, NCHW
    """
    n, c1 = x.shape[0], x.shape[1]

    # bf16 MXU inputs (f32 accumulation inside the kernel); cast before im2col
    # so the k*k-expanded patch array moves half the bytes through HBM.
    x_bf = x.astype(jnp.bfloat16)
    w_bf = weight.astype(jnp.bfloat16)

    patches_t, ho, wo = _im2col_t(x_bf, k, p, s, d)    # (K, M) bf16
    kk, m = patches_t.shape

    # Tile selection: lane-dense M tiles (multiple of 128), K tiled when large.
    tile_m = max(128, min(tile_m, _round_up(m, 128)))
    m_pad = _round_up(m, tile_m)
    if kk <= max_tile_k:
        tile_k = _round_up(kk, 16)     # single K block (full-dim)
    else:
        tile_k = max_tile_k            # multiple of 128 -> legal lane block
    kk_pad = _round_up(kk, tile_k)

    patches_t = jnp.pad(patches_t, ((0, kk_pad - kk), (0, m_pad - m)))
    w_mat = jnp.pad(w_bf.reshape(c2, c1 * k * k), ((0, 0), (0, kk_pad - kk)))

    num_m = m_pad // tile_m
    num_k = kk_pad // tile_k
    neg_slope = float(c2)  # nn.LeakyReLU(c2) -> negative_slope = c2 (sic)

    cost = pl.CostEstimate(
        flops=2 * m_pad * kk_pad * c2,
        transcendentals=0,
        bytes_accessed=(patches_t.size * 2 + w_mat.size * 2
                        + m_pad * c2 * 4 + 2 * num_m * c2 * 4),
    )

    # ---- kernel 1: K-tiled GEMM + LeakyReLU + BN partial statistics -------
    y_t, sum_p, sq_p = pl.pallas_call(
        functools.partial(_gemm_lrelu_stats_kernel, neg_slope=neg_slope),
        out_shape=(
            jax.ShapeDtypeStruct((c2, m_pad), jnp.float32),
            jax.ShapeDtypeStruct((num_m, c2, 1), jnp.float32),
            jax.ShapeDtypeStruct((num_m, c2, 1), jnp.float32),
        ),
        grid_spec=pltpu.PrefetchScalarGridSpec(
            num_scalar_prefetch=0,
            grid=(num_m, num_k),
            in_specs=[
                pl.BlockSpec((c2, tile_k), lambda mt, kt: (0, kt)),
                pl.BlockSpec((tile_k, tile_m), lambda mt, kt: (kt, mt)),
            ],
            out_specs=(
                pl.BlockSpec((c2, tile_m), lambda mt, kt: (0, mt)),
                pl.BlockSpec((1, c2, 1), lambda mt, kt: (mt, 0, 0)),
                pl.BlockSpec((1, c2, 1), lambda mt, kt: (mt, 0, 0)),
            ),
            scratch_shapes=[pltpu.VMEM((c2, tile_m), jnp.float32)],
        ),
        compiler_params=pltpu.CompilerParams(
            dimension_semantics=("parallel", "arbitrary")),
        cost_estimate=cost,
    )(w_mat, patches_t)

    # ---- tiny host reduce: BN training-mode statistics (biased) -----------
    ch_sum = jnp.sum(sum_p[:, :, 0], axis=0)           # (c2,)
    ch_sq = jnp.sum(sq_p[:, :, 0], axis=0)             # (c2,)
    mean = ch_sum / m                                  # divide by real count
    var = jnp.maximum(ch_sq / m - mean * mean, 0.0)
    scale = gamma * lax.rsqrt(var + eps)
    shift = beta - mean * scale
    ab = jnp.stack([scale, shift], axis=-1)            # (c2, 2) f32

    # ---- kernel 2: tiled, lane-dense normalize -----------------------------
    out_t = pl.pallas_call(
        _bn_apply_kernel,
        out_shape=jax.ShapeDtypeStruct((c2, m_pad), jnp.float32),
        grid_spec=pltpu.PrefetchScalarGridSpec(
            num_scalar_prefetch=0,
            grid=(num_m,),
            in_specs=[
                pl.BlockSpec((c2, 2), lambda mt: (0, 0)),
                pl.BlockSpec((c2, tile_m), lambda mt: (0, mt)),
            ],
            out_specs=pl.BlockSpec((c2, tile_m), lambda mt: (0, mt)),
        ),
        compiler_params=pltpu.CompilerParams(
            dimension_semantics=("parallel",)),
    )(ab, y_t)

    # (c2, M) -> NCHW.
    # TODO(synk): this slice+reshape+transpose is one fused XLA pass; emitting
    # NCHW directly from the normalize kernel requires per-image lane alignment
    # (ho*wo % 128 == 0) and is skipped for shape generality.
    out = out_t[:, :m].reshape(c2, n, ho, wo).transpose(1, 0, 2, 3)
    return out


# ---------------------------------------------------------------------------
# Reference (plain JAX) for sanity checking
# ---------------------------------------------------------------------------
def _reference_forward(x, weight, gamma, beta, *, k, p, s, d, c2, eps=1e-5):
    # Match the kernel's bf16 MXU input rounding (both sides accumulate in f32)
    # so the comparison isolates kernel correctness, not dtype policy.
    xr = x.astype(jnp.bfloat16).astype(jnp.float32)
    wr = weight.astype(jnp.bfloat16).astype(jnp.float32)
    conv = lax.conv_general_dilated(
        xr, wr,
        window_strides=(s, s),
        padding=[(p, p), (p, p)],
        rhs_dilation=(d, d),
        dimension_numbers=("NCHW", "OIHW", "NCHW"),
    )
    neg = float(c2)
    act = jnp.where(conv >= 0, conv, neg * conv)
    mean = jnp.mean(act, axis=(0, 2, 3), keepdims=True)
    var = jnp.mean((act - mean) ** 2, axis=(0, 2, 3), keepdims=True)
    g = gamma.reshape(1, c2, 1, 1)
    b = beta.reshape(1, c2, 1, 1)
    return (act - mean) * lax.rsqrt(var + eps) * g + b


if __name__ == "__main__":
    # Small, deterministic problem: c1=4, c2=8, k=3, p=1, s=1, d=1
    N, C1, C2, H, W = 2, 4, 8, 16, 16
    K, P, S, D = 3, 1, 1, 1

    key = jax.random.PRNGKey(0)
    kx, kw = jax.random.split(key)
    x = jax.random.normal(kx, (N, C1, H, W), dtype=jnp.float32)
    weight = 0.1 * jax.random.normal(kw, (C2, C1, K, K), dtype=jnp.float32)
    gamma = jnp.ones((C2,), dtype=jnp.float32)   # BN affine init
    beta = jnp.zeros((C2,), dtype=jnp.float32)

    out = conv_module_forward(x, weight, gamma, beta,
                              k=K, p=P, s=S, d=D, c2=C2)
    out = jax.block_until_ready(out)

    ref = _reference_forward(x, weight, gamma, beta,
                             k=K, p=P, s=S, d=D, c2=C2)
    ref = jax.block_until_ready(ref)

    assert out.shape == (N, C2, H, W), out.shape
    np.testing.assert_allclose(np.asarray(out), np.asarray(ref),
                               rtol=1e-2, atol=1e-2)
    print("KERNEL_OK")
</pallas_src>

<mosaic_0001>
module attributes {stable_mosaic.version = 11 : i64} {
  func.func @_gemm_lrelu_stats_kernel(%arg0: i32, %arg1: i32, %arg2: memref<8x48xbf16, #tpu.memory_space<vmem>>, %arg3: memref<48x512xbf16, #tpu.memory_space<vmem>>, %arg4: memref<8x512xf32, #tpu.memory_space<vmem>>, %arg5: memref<1x8x1xf32, #tpu.memory_space<vmem>>, %arg6: memref<1x8x1xf32, #tpu.memory_space<vmem>>, %arg7: memref<8x512xf32, #tpu.memory_space<vmem>>) attributes {dimension_semantics = [#tpu.dimension_semantics<parallel>, #tpu.dimension_semantics<arbitrary>], iteration_bounds = array<i64: 1, 1>, scalar_prefetch = 0 : i64, scratch_operands = 1 : i64, tpu.core_type = #tpu.core_type<tc>, window_params = [{transform_indices = @transform_0, window_bounds = array<i64: 8, 48>}, {transform_indices = @transform_1, window_bounds = array<i64: 48, 512>}, {transform_indices = @transform_2, window_bounds = array<i64: 8, 512>}, {transform_indices = @transform_3, window_bounds = array<i64: 1, 8, 1>}, {transform_indices = @transform_4, window_bounds = array<i64: 1, 8, 1>}]} {
    %c0_i32 = arith.constant 0 : i32
    %0 = arith.cmpi eq, %arg1, %c0_i32 : i32
    %1 = arith.extui %0 : i1 to i32
    %c0_i32_0 = arith.constant 0 : i32
    %2 = arith.cmpi ne, %1, %c0_i32_0 : i32
    scf.if %2 {
      %cst_10 = arith.constant 0.000000e+00 : f32
      %12 = vector.broadcast %cst_10 : f32 to vector<8x512xf32>
      %c0_11 = arith.constant 0 : index
      %c0_12 = arith.constant 0 : index
      %13 = vector.load %arg7[%c0_11, %c0_12] : memref<8x512xf32, #tpu.memory_space<vmem>>, vector<8x512xf32>
      tpu.vector_store %arg7[%c0_11, %c0_12], %12 {strides = array<i32>} : memref<8x512xf32, #tpu.memory_space<vmem>>, vector<8x512xf32>,
    } else {
    }
    %c0 = arith.constant 0 : index
    %c0_1 = arith.constant 0 : index
    %3 = vector.load %arg7[%c0, %c0_1] : memref<8x512xf32, #tpu.memory_space<vmem>>, vector<8x512xf32>
    %c0_2 = arith.constant 0 : index
    %c0_3 = arith.constant 0 : index
    %4 = vector.load %arg2[%c0_2, %c0_3] : memref<8x48xbf16, #tpu.memory_space<vmem>>, vector<8x48xbf16>
    %c0_4 = arith.constant 0 : index
    %c0_5 = arith.constant 0 : index
    %5 = vector.load %arg3[%c0_4, %c0_5] : memref<48x512xbf16, #tpu.memory_space<vmem>>, vector<48x512xbf16>
    %cst = arith.constant dense<0.000000e+00> : vector<8x512xf32>
    %6 = tpu.matmul %4, %5, %cst {dimension_numbers = #tpu.dot_dimension_numbers<[1], [0], [0], [1], [0, 0, 1, 1], [], []>} : vector<8x48xbf16>, vector<48x512xbf16>, vector<8x512xf32> -> vector<8x512xf32>
    %7 = arith.addf %3, %6 : vector<8x512xf32>
    %c0_6 = arith.constant 0 : index
    %c0_7 = arith.constant 0 : index
    %8 = vector.load %arg7[%c0_6, %c0_7] : memref<8x512xf32, #tpu.memory_space<vmem>>, vector<8x512xf32>
    tpu.vector_store %arg7[%c0_6, %c0_7], %7 {strides = array<i32>} : memref<8x512xf32, #tpu.memory_space<vmem>>, vector<8x512xf32>,
    %c0_i32_8 = arith.constant 0 : i32
    %9 = arith.cmpi eq, %arg1, %c0_i32_8 : i32
    %10 = arith.extui %9 : i1 to i32
    %c0_i32_9 = arith.constant 0 : i32
    %11 = arith.cmpi ne, %10, %c0_i32_9 : i32
    scf.if %11 {
      %c0_10 = arith.constant 0 : index
      %c0_11 = arith.constant 0 : index
      %12 = vector.load %arg7[%c0_10, %c0_11] : memref<8x512xf32, #tpu.memory_space<vmem>>, vector<8x512xf32>
      %cst_12 = arith.constant 0.000000e+00 : f32
      %13 = vector.broadcast %cst_12 : f32 to vector<8x512xf32>
      %14 = arith.cmpf oge, %12, %13 : vector<8x512xf32>
      %cst_13 = arith.constant 8.000000e+00 : f32
      %15 = vector.broadcast %cst_13 : f32 to vector<8x512xf32>
      %16 = arith.mulf %15, %12 : vector<8x512xf32>
      %17 = arith.select %14, %12, %16 : vector<8x512xi1>, vector<8x512xf32>
      %c0_14 = arith.constant 0 : index
      %c0_15 = arith.constant 0 : index
      %18 = vector.load %arg4[%c0_14, %c0_15] : memref<8x512xf32, #tpu.memory_space<vmem>>, vector<8x512xf32>
      tpu.vector_store %arg4[%c0_14, %c0_15], %17 {strides = array<i32>} : memref<8x512xf32, #tpu.memory_space<vmem>>, vector<8x512xf32>,
      %cst_16 = arith.constant dense<0.000000e+00> : vector<8xf32>
      %19 = vector.multi_reduction <add>, %17, %cst_16 [1] : vector<8x512xf32> to vector<8xf32>
      %20 = vector.shape_cast %19 : vector<8xf32> to vector<8x1xf32>
      %21 = vector.shape_cast %20 : vector<8x1xf32> to vector<1x8x1xf32>
      %c0_17 = arith.constant 0 : index
      %c0_18 = arith.constant 0 : index
      %c0_19 = arith.constant 0 : index
      %22 = vector.load %arg5[%c0_17, %c0_18, %c0_19] : memref<1x8x1xf32, #tpu.memory_space<vmem>>, vector<1x8x1xf32>
      tpu.vector_store %arg5[%c0_17, %c0_18, %c0_19], %21 {strides = array<i32>} : memref<1x8x1xf32, #tpu.memory_space<vmem>>, vector<1x8x1xf32>,
      %23 = arith.mulf %17, %17 : vector<8x512xf32>
      %cst_20 = arith.constant dense<0.000000e+00> : vector<8xf32>
      %24 = vector.multi_reduction <add>, %23, %cst_20 [1] : vector<8x512xf32> to vector<8xf32>
      %25 = vector.shape_cast %24 : vector<8xf32> to vector<8x1xf32>
      %26 = vector.shape_cast %25 : vector<8x1xf32> to vector<1x8x1xf32>
      %c0_21 = arith.constant 0 : index
      %c0_22 = arith.constant 0 : index
      %c0_23 = arith.constant 0 : index
      %27 = vector.load %arg6[%c0_21, %c0_22, %c0_23] : memref<1x8x1xf32, #tpu.memory_space<vmem>>, vector<1x8x1xf32>
      tpu.vector_store %arg6[%c0_21, %c0_22, %c0_23], %26 {strides = array<i32>} : memref<1x8x1xf32, #tpu.memory_space<vmem>>, vector<1x8x1xf32>,
    } else {
    }
    return
  }
  func.func @transform_0(%arg0: i32, %arg1: i32) -> (i32, i32) {
    %c0_i32 = arith.constant 0 : i32
    %c0_i32_0 = arith.constant 0 : i32
    return %c0_i32, %arg1 : i32, i32
  }
  func.func @transform_1(%arg0: i32, %arg1: i32) -> (i32, i32) {
    %c0_i32 = arith.constant 0 : i32
    return %arg1, %arg0 : i32, i32
  }
  func.func @transform_2(%arg0: i32, %arg1: i32) -> (i32, i32) {
    %c0_i32 = arith.constant 0 : i32
    %c0_i32_0 = arith.constant 0 : i32
    return %c0_i32, %arg0 : i32, i32
  }
  func.func @transform_3(%arg0: i32, %arg1: i32) -> (i32, i32, i32) {
    %c0_i32 = arith.constant 0 : i32
    %c0_i32_0 = arith.constant 0 : i32
    %c0_i32_1 = arith.constant 0 : i32
    return %arg0, %c0_i32, %c0_i32_0 : i32, i32, i32
  }
  func.func @transform_4(%arg0: i32, %arg1: i32) -> (i32, i32, i32) {
    %c0_i32 = arith.constant 0 : i32
    %c0_i32_0 = arith.constant 0 : i32
    %c0_i32_1 = arith.constant 0 : i32
    return %arg0, %c0_i32, %c0_i32_0 : i32, i32, i32
  }
}

</mosaic_0001>

<bundles_post_ra>
// kernel: tpu_custom_call.1
= control target key start
LH: loop header
LB: loop body
LE: loop exit
PB: predicated region body
PF: predicated region fallthrough
CT: control target
= control target key end

     0   :  { %10 = vsyncpa [#allocation4], 0  ;;  %s475_s0 = inlined_call_operand.hbm [shape: bf16[8,48], index: 0, kind: input, shape index: {}]   ;;  %s476_s1 = inlined_call_operand.hbm [shape: bf16[48,512], index: 1, kind: input, shape index: {}]   ;;  %s477_s2 = inlined_call_operand.hbm [shape: f32[8,512], index: 2, kind: output, shape index: {0}]   ;;  %s478_s3 = inlined_call_operand.vmem [shape: f32[1,8,1], index: 3, kind: output, shape index: {1}]   ;;  %s479_s4 = inlined_call_operand.vmem [shape: f32[1,8,1], index: 4, kind: output, shape index: {2}]  }
   0x1   :  { %11 = vsyncpa [#allocation7], 0 }
   0x2   :  { %12 = vsyncpa [#allocation5], 0  ;;  %s395_s15 = smov [#allocation3]   ;;  %s396_s17 = smov [#allocation6]  }
   0x3   :  { %s19_s16 = sshll.u32 %s395_s15, 4  ;;  %s28_s18 = sshll.u32 %s396_s17, 4  ;;  %s20_s16 = int_to_ptr.vmem [resolvable:$true] %s19_s16  ;;  %s426_s18 = int_to_ptr.vmem [resolvable:$true] %s28_s18 }
   0x4   :  { %s323_s21 = scalar_lea.hbm %s475_s0, 64 }
   0x5   :  { %p324_p0 = scmp.ne.s32.totalorder %s475_s0, %s323_s21  ;;  %p327_p1 = scmp.lt.u32.totalorder %s323_s21, %s475_s0 }
   0x7   :  { %p329_p2 = pnand %p327_p1, %p324_p0 }
   0x9   :  { %332 = shalt.err (!%p329_p2)
}
   0xa   :  { %s333_s26 = scalar_lea.vmem %s20_s16, 64  ;;  %p338_p4 = scmp.lt.s32.totalorder %s20_s16, %s20_s16 }
   0xb   :  { %p334_p3 = scmp.ne.s32.totalorder %s20_s16, %s333_s26  ;;  %p339_p5 = scmp.lt.s32.totalorder %s333_s26, %s333_s26 }
   0xd   :  { %p340_p6 = por %p339_p5, %p338_p4 }
   0xf   :  { %p341_p7 = pnand %p340_p6, %p334_p3 }
  0x11   :  { %344 = shalt.err (!%p341_p7)
}
  0x12   :  { %22 = dma.hbm_to_vmem [thread:$0]  %s475_s0, 64, %s20_s16, [#allocation4]  }
  0x13   :  { %s345_s5 = scalar_lea.hbm %s476_s1, 1536 }
  0x14   :  { %p346_p8 = scmp.ne.s32.totalorder %s476_s1, %s345_s5  ;;  %p349_p9 = scmp.lt.u32.totalorder %s345_s5, %s476_s1 }
  0x16   :  { %p351_p10 = pnand %p349_p9, %p346_p8 }
  0x18   :  { %354 = shalt.err (!%p351_p10)
}
  0x19   :  { %s355_s10 = scalar_lea.vmem %s426_s18, 1536  ;;  %p360_p12 = scmp.lt.s32.totalorder %s426_s18, %s426_s18 }
  0x1a   :  { %p356_p11 = scmp.ne.s32.totalorder %s426_s18, %s355_s10  ;;  %p361_p13 = scmp.lt.s32.totalorder %s355_s10, %s355_s10 }
  0x1c   :  { %p362_p0 = por %p361_p13, %p360_p12 }
  0x1e   :  { %p363_p1 = pnand %p362_p0, %p356_p11 }
  0x20   :  { %366 = shalt.err (!%p363_p1)
}
  0x21   :  { %s397_s0 = smov 256   ;;  %s398_s11 = smov 16  }
  0x22   :  { %34 = dma.hbm_to_vmem [thread:$0]  %s476_s1, 1536, %s426_s18, [#allocation7], %s397_s0, %s397_s0, %s398_s11  }
  0x23   :  { %389 = dma.done.wait [#allocation4], 64  }
  0x24   :  { %390 = vsyncadd [#allocation4], 4294967232 }
  0x25   :  { %391 = dma.done.wait [#allocation7], 1536  }
  0x26   :  { %392 = vsyncadd [#allocation7], 4294965760  ;;  %v399_v0 = vmov 0   ;;  %v305_v1 = vld [vmem:[#allocation6 + $0x4] ss:$16 sps:$4 sm:$0xff]   ;;  %vm127_vm0 = vcmask 392192  }
  0x27   :  { %163 = vmatprep.mubr.bf16.mxu0 %v399_v0  ;;  %204 = vmatprep.mubr.bf16.mxu1 %v399_v0  ;;  %v307_v2 = vld [vmem:[#allocation6 + $0xc] ss:$16 sps:$4 sm:$0xff]   ;;  %v309_v3 = vld [vmem:[#allocation6] ss:$16 sps:$4 sm:$0xff]   ;;  %v310_v4 = vld [vmem:[#allocation6 + $0x8] ss:$16 sps:$4 sm:$0xff]  }
  0x28   :  { %131 = vmatprep.subr.bf16.mxu0 %v305_v1  ;;  %172 = vmatprep.subr.bf16.mxu1 %v307_v2  ;;  %v311_v5 = vld [vmem:[#allocation6 + $0x24] ss:$16 sps:$4 sm:$0xff]   ;;  %v313_v6 = vld [vmem:[#allocation6 + $0x2c] ss:$16 sps:$4 sm:$0xff]   ;;  %v315_v7 = vld [vmem:[#allocation6 + $0x20] ss:$16 sps:$4 sm:$0xff]  }
  0x29   :  { %132 = vmatpush1.bf16.msra.mxu0 %v309_v3  ;;  %173 = vmatpush1.bf16.msra.mxu1 %v310_v4  ;;  %v316_v8 = vld [vmem:[#allocation6 + $0x28] ss:$16 sps:$4 sm:$0xff]   ;;  %v317_v9 = vld [vmem:[#allocation6 + $0x44] ss:$16 sps:$4 sm:$0xff]   ;;  %v319_v10 = vld [vmem:[#allocation6 + $0x4c] ss:$16 sps:$4 sm:$0xff]  }
  0x2a   :  { %133 = vmatprep.subr.bf16.mxu0 %v311_v5  ;;  %174 = vmatprep.subr.bf16.mxu1 %v313_v6  ;;  %v321_v11 = vld [vmem:[#allocation6 + $0x40] ss:$16 sps:$4 sm:$0xff]   ;;  %v322_v12 = vld [vmem:[#allocation6 + $0x48] ss:$16 sps:$4 sm:$0xff]   ;;  %v54_v13 = vld [vmem:[#allocation3] sm:$0xf] }
  0x2b   :  { %s400_s1 = smov [#allocation8]  }
  0x2c   :  { %s267_s14 = sshll.u32 %s400_s1, 4  ;;  %s268_s14 = int_to_ptr.vmem [resolvable:$true] %s267_s14 }
  0x2d   :  { %134 = vmatpush1.bf16.msra.mxu0 %v315_v7  ;;  %175 = vmatpush1.bf16.msra.mxu1 %v316_v8  ;;  %s367_s15 = scalar_lea.vmem %s268_s14, 512  ;;  %p372_p3 = scmp.lt.s32.totalorder %s268_s14, %s268_s14 }
  0x2e   :  { %135 = vmatprep.subr.bf16.mxu0 %v317_v9  ;;  %176 = vmatprep.subr.bf16.mxu1 %v319_v10  ;;  %p368_p2 = scmp.ne.s32.totalorder %s268_s14, %s367_s15  ;;  %p373_p4 = scmp.lt.s32.totalorder %s367_s15, %s367_s15 }
  0x30   :  { %p374_p5 = por %p373_p4, %p372_p3 }
  0x31   :  { %136 = vmatpush1.bf16.msra.mxu0 %v321_v11  ;;  %177 = vmatpush1.bf16.msra.mxu1 %v322_v12 }
  0x32   :  { %p375_p6 = pnand %p374_p5, %p368_p2 }
  0x34   :  { %297 = vmatmul.mubr.msk.bf16.vlgmr.msra.gmra.mrb[0].mxu0 %vm127_vm0, %v54_v13  ;;  %298 = vmatmul.mubr.msk.bf16.vlgmr.msra.gmra.mrb[0].mxu1 %vm127_vm0, %v54_v13 }
 0x107   :  { %v165_v14 = vpop.f32.mrb[0].mxu0  ;;  %v206_v15 = vpop.f32.mrb[0].mxu1 }
 0x108   :  { %vm228_vm1 = vcmp.ge.f32.partialorder %v165_v14, 0.0  ;;  %v232_v16 = vmul.f32 8.0, %v165_v14  ;;  %vm230_vm2 = vcmp.ge.f32.partialorder %v206_v15, 0.0  ;;  %v234_v17 = vmul.f32 8.0, %v206_v15  ;;  %v167_v18 = vpop.f32.mrb[1].mxu0  ;;  %v208_v19 = vpop.f32.mrb[1].mxu1 }
 0x109   :  { %vm229_vm3 = vcmp.ge.f32.partialorder %v167_v18, 0.0  ;;  %v233_v20 = vmul.f32 8.0, %v167_v18  ;;  %vm231_vm4 = vcmp.ge.f32.partialorder %v208_v19, 0.0  ;;  %v235_v21 = vmul.f32 8.0, %v208_v19  ;;  %v169_v22 = vpop.f32.mrb[2].mxu0  ;;  %v210_v23 = vpop.f32.mrb[2].mxu1 }
 0x10a   :  { %v236_v24 = vsel %vm228_vm1, %v165_v14, %v232_v16  ;;  %v238_v25 = vsel %vm230_vm2, %v206_v15, %v234_v17  ;;  %v170_v26 = vpop.f32.mrb[3].mxu0  ;;  %v211_v27 = vpop.f32.mrb[3].mxu1 }
 0x10b   :  { %240 = vst [vmem:[#allocation8] sm:$0xff] %v236_v24  ;;  %v251_v28 = vmul.f32 %v236_v24, %v236_v24  ;;  %242 = vst [vmem:[#allocation8 + $0x10] sm:$0xff] %v238_v25  ;;  %v237_v29 = vsel %vm229_vm3, %v167_v18, %v233_v20  ;;  %v239_v30 = vsel %vm231_vm4, %v208_v19, %v235_v21 }
 0x10c   :  { %241 = vst [vmem:[#allocation8 + $0x8] sm:$0xff] %v237_v29  ;;  %v252_v31 = vmul.f32 %v237_v29, %v237_v29  ;;  %243 = vst [vmem:[#allocation8 + $0x18] sm:$0xff] %v239_v30  ;;  %v244_v32 = vadd.f32 %v237_v29, %v236_v24  ;;  %v253_v34 = vmul.f32 %v238_v25, %v238_v25 }
 0x10d   :  { %v254_v37 = vmul.f32 %v239_v30, %v239_v30 }
 0x10e   :  { %v245_v33 = vadd.f32 %v244_v32, %v238_v25  ;;  %v255_v35 = vadd.f32 %v252_v31, %v251_v28 }
 0x110   :  { %v246_v36 = vadd.f32 %v245_v33, %v239_v30  ;;  %v256_v38 = vadd.f32 %v255_v35, %v253_v34 }
 0x112   :  { %247 = vadd.xlane.f32.xlu0 %v246_v36  ;;  %v257_v39 = vadd.f32 %v256_v38, %v254_v37 }
 0x116   :  { %258 = vadd.xlane.f32.xlu0 %v257_v39 }
 0x117   :  { %378 = shalt.err (!%p375_p6)
}
 0x118   :  { %s379_s18 = scalar_lea.hbm %s477_s2, 512 }
 0x119   :  { %p380_p7 = scmp.ne.s32.totalorder %s477_s2, %s379_s18  ;;  %p383_p8 = scmp.lt.u32.totalorder %s379_s18, %s477_s2 }
 0x11b   :  { %p385_p9 = pnand %p383_p8, %p380_p7 }
 0x11d   :  { %388 = shalt.err (!%p385_p9)
}
 0x11e   :  { %270 = dma.vmem_to_hbm [thread:$0]  %s268_s14, 512, %s477_s2, [#allocation5]   ;;  %vm249_vm5 = vcmask 7168  }
 0x19f   :  { %v248_v40 = vpop.xlane.xlu0 %247 }
 0x1a0   :  { %250 = vst.msk [vmem:[%s478_s3] sm:$0xff] %vm249_vm5, %v248_v40 }
 0x1a3   :  { %v259_v41 = vpop.xlane.xlu0 %258 }
 0x1a4   :  { %260 = vst.msk [vmem:[%s479_s4] sm:$0xff] %vm249_vm5, %v259_v41 }
 0x1a5   :  { %393 = dma.done.wait [#allocation5], 512  }
 0x1a6   :  { %394 = vsyncadd [#allocation5], 4294966784 }
 0x1a7   :  { %282 = vsyncpa [#allocation4], 1 }
 0x1a8   :  { %283 = vsyncpa [#allocation7], 1 }
 0x1a9   :  { %284 = vsyncpa [#allocation5], 1 }

</bundles_post_ra>
